<compile_context>
chip_gen: v7x
topology: tpu7x:2x2x1
jax: 0.10.0
libtpu: 0.0.40
codegen_flags: <defaults>
</compile_context>

<pallas_src>
import functools

import jax
import jax.numpy as jnp
from jax.experimental import pallas as pl
from jax.experimental.pallas import tpu as pltpu

_EPS = 1e-6          # matches nn.LayerNorm(..., eps=1e-06) in the PyTorch module
_LANE = 128


def _round_up(v, m):
    return ((v + m - 1) // m) * m


# -----------------------------------------------------------------------------
# Kernel
# -----------------------------------------------------------------------------
def _projection_kernel(x_ref, w1_ref, b1_ref, w2_ref, b2_ref, g2_ref, be2_ref,
                       o_ref, *, n1, n2):
    # ---- fc1: bf16 x (cast in wrapper) x bf16 W1 on the MXU, f32 acc ----
    h = jnp.dot(x_ref[...], w1_ref[...],
                preferred_element_type=jnp.float32) + b1_ref[...]
    h = jnp.maximum(h, 0.0)                                     # ReLU

    # ---- LayerNorm-1: one-pass stats; divisor = true (unpadded) width ----
    # Padded columns of h are exactly 0 after ReLU, so the sums are exact.
    s1 = jnp.sum(h, axis=-1, keepdims=True)
    q1 = jnp.sum(h * h, axis=-1, keepdims=True)
    mu1 = s1 * (1.0 / n1)
    var1 = jnp.maximum(q1 * (1.0 / n1) - mu1 * mu1, 0.0)
    h = (h - mu1) * jax.lax.rsqrt(var1 + _EPS)
    # (LN1 affine g1/be1 is folded into W2/b2; padded W2 rows are zero, so the
    #  nonzero normalized values in padded columns contribute nothing.)

    # ---- fc2 ----
    z = jnp.dot(h.astype(jnp.bfloat16), w2_ref[...],
                preferred_element_type=jnp.float32) + b2_ref[...]
    z = jnp.maximum(z, 0.0)                                     # ReLU

    # ---- LayerNorm-2 (with affine) ----
    s2 = jnp.sum(z, axis=-1, keepdims=True)
    q2 = jnp.sum(z * z, axis=-1, keepdims=True)
    mu2 = s2 * (1.0 / n2)
    var2 = jnp.maximum(q2 * (1.0 / n2) - mu2 * mu2, 0.0)
    o_ref[...] = ((z - mu2) * jax.lax.rsqrt(var2 + _EPS) * g2_ref[...]
                  + be2_ref[...]).astype(o_ref.dtype)


# -----------------------------------------------------------------------------
# Parameter preparation: fold LN1 affine into fc2, cast to bf16, zero-pad lanes
# -----------------------------------------------------------------------------
def _pad2(a, rows, cols):
    return jnp.pad(a, ((0, rows - a.shape[0]), (0, cols - a.shape[1])))


def _prepare_params(params, d_in_p, d_mid_p, d_out_p):
    w1 = params["w1"].astype(jnp.float32)
    b1 = params["b1"].astype(jnp.float32).reshape(1, -1)
    w2 = params["w2"].astype(jnp.float32)
    b2 = params["b2"].astype(jnp.float32).reshape(1, -1)
    g1 = params["g1"].astype(jnp.float32).reshape(-1, 1)
    be1 = params["be1"].astype(jnp.float32).reshape(1, -1)
    g2 = params["g2"].astype(jnp.float32).reshape(1, -1)
    be2 = params["be2"].astype(jnp.float32).reshape(1, -1)

    w2_f = g1 * w2                       # diag(g1) @ W2
    b2_f = b2 + be1 @ w2                 # be1 @ W2 + b2

    return dict(
        w1=_pad2(w1, d_in_p, d_mid_p).astype(jnp.bfloat16),
        b1=_pad2(b1, 1, d_mid_p),
        w2=_pad2(w2_f, d_mid_p, d_out_p).astype(jnp.bfloat16),
        b2=_pad2(b2_f, 1, d_out_p),
        g2=_pad2(g2, 1, d_out_p),
        be2=_pad2(be2, 1, d_out_p),
    )


def _vmem_budget_bytes():
    """~75% of per-core VMEM (96 MiB on 128 MiB chips, 48 MiB on v7x)."""
    cap = 64 * 2**20
    try:
        info = pltpu.get_tpu_info()
        cap = int(getattr(info, "vmem_capacity_bytes", cap))
    except Exception:
        pass
    return (cap * 3) // 4


# -----------------------------------------------------------------------------
# Wrapper
# -----------------------------------------------------------------------------
@functools.partial(jax.jit, static_argnames=("batch_tile",))
def projection_dis_mirna(x, params, *, batch_tile=512):
    """Pallas forward pass for Projection_dis_miRNA.

    x       : (batch, 2*input_dim) float32
    params  : dict with w1 (2I,2H), b1 (1,2H), g1 (1,2H), be1 (1,2H),
                         w2 (2H, H), b2 (1, H), g2 (1, H), be2 (1, H)
    returns : (batch, hid_dim) float32
    """
    batch, d_in = x.shape
    d_mid = params["w1"].shape[1]
    d_out = params["w2"].shape[1]
    d_in_p = _round_up(d_in, _LANE)
    d_mid_p = _round_up(d_mid, _LANE)
    d_out_p = _round_up(d_out, _LANE)

    p = _prepare_params(params, d_in_p, d_mid_p, d_out_p)

    # ---- adaptive batch tile against the per-core VMEM budget ----
    budget = _vmem_budget_bytes()
    weight_bytes = ((d_in_p * d_mid_p + d_mid_p * d_out_p) * 2   # bf16, Buffered(1)
                    + (d_mid_p + 3 * d_out_p) * 4)               # biases / LN2 affine

    def tile_bytes(bt):
        return (2 * bt * d_in_p * 2        # bf16 x tiles (double-buffered)
                + 2 * bt * d_out_p * 4     # f32 out tiles (double-buffered)
                + bt * d_mid_p * 6         # f32 h + bf16 h (fc2 operand)
                + 2 * bt * d_out_p * 4)    # f32 z + LN temps headroom

    if batch <= 32:
        bt = _round_up(batch, 8)           # single full-batch tile
    else:
        bt = _round_up(min(batch_tile, batch), 16)
        while bt > 16 and weight_bytes + tile_bytes(bt) > budget:
            bt = max(16, _round_up(bt // 2, 16))
        # keep >= 2 grid steps so the "parallel" axis shards both v7x cores
        if _round_up(batch, bt) // bt < 2:
            bt = max(16, _round_up((batch + 1) // 2, 16))
    padded_b = _round_up(batch, bt)
    grid = (padded_b // bt,)

    need = weight_bytes + tile_bytes(bt)
    vmem_limit = max(int(need * 1.25), 32 * 2**20)
    vmem_limit = int(min(vmem_limit, max(budget, int(need * 1.1))))

    # zero-pad batch + feature dims, ship x as bf16 (halves activation DMA)
    x_p = jnp.pad(x, ((0, padded_b - batch), (0, d_in_p - d_in))
                  ).astype(jnp.bfloat16)

    cost = pl.CostEstimate(
        flops=int(2 * padded_b * (d_in_p * d_mid_p + d_mid_p * d_out_p)),
        transcendentals=int(2 * padded_b),          # one rsqrt per row per LN
        bytes_accessed=int(padded_b * d_in_p * 2 + padded_b * d_out_p * 4
                           + weight_bytes),
    )

    kernel = functools.partial(_projection_kernel,
                               n1=float(d_mid), n2=float(d_out))
    const = lambda i: (0, 0)
    resident = dict(index_map=const, pipeline_mode=pl.Buffered(1))

    out = pl.pallas_call(
        kernel,
        out_shape=jax.ShapeDtypeStruct((padded_b, d_out_p), jnp.float32),
        grid=grid,
        in_specs=[
            pl.BlockSpec((bt, d_in_p), lambda i: (i, 0)),         # x tile (bf16)
            pl.BlockSpec((d_in_p, d_mid_p), **resident),          # W1
            pl.BlockSpec((1, d_mid_p), **resident),               # b1
            pl.BlockSpec((d_mid_p, d_out_p), **resident),         # W2 (LN1 folded)
            pl.BlockSpec((1, d_out_p), **resident),               # b2 (LN1 folded)
            pl.BlockSpec((1, d_out_p), **resident),               # g2
            pl.BlockSpec((1, d_out_p), **resident),               # be2
        ],
        out_specs=pl.BlockSpec((bt, d_out_p), lambda i: (i, 0)),
        compiler_params=pltpu.CompilerParams(
            dimension_semantics=("parallel",),     # megacore sharding
            vmem_limit_bytes=vmem_limit,
        ),
        cost_estimate=cost,
    )(x_p, p["w1"], p["b1"], p["w2"], p["b2"], p["g2"], p["be2"])

    return out[:batch, :d_out]


# -----------------------------------------------------------------------------
# Parameter construction + pure-JAX references for correctness checking
# -----------------------------------------------------------------------------
def init_params(key, input_dim, hid_dim):
    """Deterministic synthetic parameters (shapes match the PyTorch module)."""
    k1, k2, k3, k4 = jax.random.split(key, 4)
    d_in, d_mid, d_out = 2 * input_dim, 2 * hid_dim, hid_dim
    # PyTorch Linear weight is (out, in); stored transposed as (in, out).
    w1 = jax.random.uniform(k1, (d_in, d_mid), jnp.float32, -1.0, 1.0) / jnp.sqrt(d_in)
    b1 = jax.random.uniform(k2, (1, d_mid), jnp.float32, -1.0, 1.0) / jnp.sqrt(d_in)
    w2 = jax.random.uniform(k3, (d_mid, d_out), jnp.float32, -1.0, 1.0) / jnp.sqrt(d_mid)
    b2 = jax.random.uniform(k4, (1, d_out), jnp.float32, -1.0, 1.0) / jnp.sqrt(d_mid)
    # LayerNorm defaults: weight=1, bias=0.
    g1 = jnp.ones((1, d_mid), jnp.float32)
    be1 = jnp.zeros((1, d_mid), jnp.float32)
    g2 = jnp.ones((1, d_out), jnp.float32)
    be2 = jnp.zeros((1, d_out), jnp.float32)
    return dict(w1=w1, b1=b1, g1=g1, be1=be1, w2=w2, b2=b2, g2=g2, be2=be2)


def reference_forward_f32(x, p):
    """Exact PyTorch-module math in f32 (no folding, no bf16)."""
    h = jnp.maximum(x @ p["w1"] + p["b1"], 0.0)
    h = (h - h.mean(-1, keepdims=True)) / jnp.sqrt(h.var(-1, keepdims=True) + _EPS)
    h = h * p["g1"] + p["be1"]
    z = jnp.maximum(h @ p["w2"] + p["b2"], 0.0)
    z = (z - z.mean(-1, keepdims=True)) / jnp.sqrt(z.var(-1, keepdims=True) + _EPS)
    return z * p["g2"] + p["be2"]


def reference_forward_kernel_math(x, params):
    """Same math as the Pallas kernel (folded LN1 affine, bf16 MXU inputs)."""
    d_mid = params["w1"].shape[1]
    g1 = params["g1"].astype(jnp.float32).reshape(d_mid, 1)
    be1 = params["be1"].astype(jnp.float32).reshape(1, -1)
    w2 = params["w2"].astype(jnp.float32)
    w2_f = (g1 * w2).astype(jnp.bfloat16)
    b2_f = params["b2"].astype(jnp.float32).reshape(1, -1) + be1 @ w2

    h = jnp.dot(x.astype(jnp.bfloat16), params["w1"].astype(jnp.bfloat16),
                preferred_element_type=jnp.float32) + params["b1"].astype(jnp.float32)
    h = jnp.maximum(h, 0.0)
    h = (h - h.mean(-1, keepdims=True)) * jax.lax.rsqrt(h.var(-1, keepdims=True) + _EPS)
    z = jnp.dot(h.astype(jnp.bfloat16), w2_f,
                preferred_element_type=jnp.float32) + b2_f
    z = jnp.maximum(z, 0.0)
    z = (z - z.mean(-1, keepdims=True)) * jax.lax.rsqrt(z.var(-1, keepdims=True) + _EPS)
    return (z * params["g2"].astype(jnp.float32)
            + params["be2"].astype(jnp.float32))


if __name__ == "__main__":
    input_dim = 16
    hid_dim = 32
    batch = 8

    key = jax.random.PRNGKey(0)
    kx, kp = jax.random.split(key)
    x = jax.random.normal(kx, (batch, 2 * input_dim), jnp.float32)
    params = init_params(kp, input_dim, hid_dim)

    out = jax.block_until_ready(projection_dis_mirna(x, params))
    assert out.shape == (batch, hid_dim)

    # Tight check vs. identical (folded, bf16-matmul) math: validates the
    # Pallas plumbing, feature padding and the fused LN statistics.
    ref_bf16 = reference_forward_kernel_math(x, params)
    assert jnp.allclose(out, ref_bf16, atol=5e-4, rtol=1e-3), \
        "mismatch vs bf16 kernel-math reference"

    # Looser check vs. exact f32 PyTorch semantics (slack reflects the bf16
    # MXU-input quantization used for TPU throughput).
    ref_f32 = reference_forward_f32(x, params)
    assert jnp.allclose(out, ref_f32, atol=5e-2, rtol=5e-2), \
        "mismatch vs f32 reference"

    print("KERNEL_OK")
</pallas_src>

<mosaic_0001>
module attributes {stable_mosaic.version = 11 : i64} {
  func.func @_projection_kernel(%arg0: i32, %arg1: memref<8x128xbf16, #tpu.memory_space<vmem>>, %arg2: memref<128x128xbf16, #tpu.memory_space<vmem>>, %arg3: memref<1x128xf32, #tpu.memory_space<vmem>>, %arg4: memref<128x128xbf16, #tpu.memory_space<vmem>>, %arg5: memref<1x128xf32, #tpu.memory_space<vmem>>, %arg6: memref<1x128xf32, #tpu.memory_space<vmem>>, %arg7: memref<1x128xf32, #tpu.memory_space<vmem>>, %arg8: memref<8x128xf32, #tpu.memory_space<vmem>>) attributes {dimension_semantics = [#tpu.dimension_semantics<parallel>], iteration_bounds = array<i64: 1>, scalar_prefetch = 0 : i64, scratch_operands = 0 : i64, tpu.core_type = #tpu.core_type<tc>, window_params = [{transform_indices = @transform_0, window_bounds = array<i64: 8, 128>}, {pipeline_mode = #tpu.pipeline_mode<synchronous>, transform_indices = @transform_1, window_bounds = array<i64: 128, 128>}, {pipeline_mode = #tpu.pipeline_mode<synchronous>, transform_indices = @transform_2, window_bounds = array<i64: 1, 128>}, {pipeline_mode = #tpu.pipeline_mode<synchronous>, transform_indices = @transform_3, window_bounds = array<i64: 128, 128>}, {pipeline_mode = #tpu.pipeline_mode<synchronous>, transform_indices = @transform_4, window_bounds = array<i64: 1, 128>}, {pipeline_mode = #tpu.pipeline_mode<synchronous>, transform_indices = @transform_5, window_bounds = array<i64: 1, 128>}, {pipeline_mode = #tpu.pipeline_mode<synchronous>, transform_indices = @transform_6, window_bounds = array<i64: 1, 128>}, {transform_indices = @transform_7, window_bounds = array<i64: 8, 128>}]} {
    %c0 = arith.constant 0 : index
    %c0_0 = arith.constant 0 : index
    %0 = vector.load %arg1[%c0, %c0_0] : memref<8x128xbf16, #tpu.memory_space<vmem>>, vector<8x128xbf16>
    %c0_1 = arith.constant 0 : index
    %c0_2 = arith.constant 0 : index
    %1 = vector.load %arg2[%c0_1, %c0_2] : memref<128x128xbf16, #tpu.memory_space<vmem>>, vector<128x128xbf16>
    %cst = arith.constant dense<0.000000e+00> : vector<8x128xf32>
    %2 = tpu.matmul %0, %1, %cst {dimension_numbers = #tpu.dot_dimension_numbers<[1], [0], [0], [1], [0, 0, 1, 1], [], []>} : vector<8x128xbf16>, vector<128x128xbf16>, vector<8x128xf32> -> vector<8x128xf32>
    %c0_3 = arith.constant 0 : index
    %c0_4 = arith.constant 0 : index
    %3 = vector.load %arg3[%c0_3, %c0_4] : memref<1x128xf32, #tpu.memory_space<vmem>>, vector<1x128xf32>
    %4 = vector.broadcast %3 : vector<1x128xf32> to vector<8x128xf32>
    %5 = arith.addf %2, %4 : vector<8x128xf32>
    %cst_5 = arith.constant 0.000000e+00 : f32
    %6 = vector.broadcast %cst_5 : f32 to vector<8x128xf32>
    %7 = arith.maximumf %5, %6 : vector<8x128xf32>
    %cst_6 = arith.constant dense<0.000000e+00> : vector<8xf32>
    %8 = vector.multi_reduction <add>, %7, %cst_6 [1] : vector<8x128xf32> to vector<8xf32>
    %9 = vector.shape_cast %8 : vector<8xf32> to vector<8x1xf32>
    %10 = arith.mulf %7, %7 : vector<8x128xf32>
    %cst_7 = arith.constant dense<0.000000e+00> : vector<8xf32>
    %11 = vector.multi_reduction <add>, %10, %cst_7 [1] : vector<8x128xf32> to vector<8xf32>
    %12 = vector.shape_cast %11 : vector<8xf32> to vector<8x1xf32>
    %cst_8 = arith.constant 1.562500e-02 : f32
    %13 = vector.broadcast %cst_8 : f32 to vector<8x1xf32>
    %14 = arith.mulf %9, %13 : vector<8x1xf32>
    %cst_9 = arith.constant 1.562500e-02 : f32
    %15 = vector.broadcast %cst_9 : f32 to vector<8x1xf32>
    %16 = arith.mulf %12, %15 : vector<8x1xf32>
    %17 = arith.mulf %14, %14 : vector<8x1xf32>
    %18 = arith.subf %16, %17 : vector<8x1xf32>
    %cst_10 = arith.constant 0.000000e+00 : f32
    %19 = vector.broadcast %cst_10 : f32 to vector<8x1xf32>
    %20 = arith.maximumf %18, %19 : vector<8x1xf32>
    %21 = vector.broadcast %14 : vector<8x1xf32> to vector<8x128xf32>
    %22 = arith.subf %7, %21 : vector<8x128xf32>
    %cst_11 = arith.constant 9.99999997E-7 : f32
    %23 = vector.broadcast %cst_11 : f32 to vector<8x1xf32>
    %24 = arith.addf %20, %23 : vector<8x1xf32>
    %25 = math.rsqrt %24 : vector<8x1xf32>
    %26 = vector.broadcast %25 : vector<8x1xf32> to vector<8x128xf32>
    %27 = arith.mulf %22, %26 : vector<8x128xf32>
    %28 = arith.truncf %27 : vector<8x128xf32> to vector<8x128xbf16>
    %c0_12 = arith.constant 0 : index
    %c0_13 = arith.constant 0 : index
    %29 = vector.load %arg4[%c0_12, %c0_13] : memref<128x128xbf16, #tpu.memory_space<vmem>>, vector<128x128xbf16>
    %cst_14 = arith.constant dense<0.000000e+00> : vector<8x128xf32>
    %30 = tpu.matmul %28, %29, %cst_14 {dimension_numbers = #tpu.dot_dimension_numbers<[1], [0], [0], [1], [0, 0, 1, 1], [], []>} : vector<8x128xbf16>, vector<128x128xbf16>, vector<8x128xf32> -> vector<8x128xf32>
    %c0_15 = arith.constant 0 : index
    %c0_16 = arith.constant 0 : index
    %31 = vector.load %arg5[%c0_15, %c0_16] : memref<1x128xf32, #tpu.memory_space<vmem>>, vector<1x128xf32>
    %32 = vector.broadcast %31 : vector<1x128xf32> to vector<8x128xf32>
    %33 = arith.addf %30, %32 : vector<8x128xf32>
    %cst_17 = arith.constant 0.000000e+00 : f32
    %34 = vector.broadcast %cst_17 : f32 to vector<8x128xf32>
    %35 = arith.maximumf %33, %34 : vector<8x128xf32>
    %cst_18 = arith.constant dense<0.000000e+00> : vector<8xf32>
    %36 = vector.multi_reduction <add>, %35, %cst_18 [1] : vector<8x128xf32> to vector<8xf32>
    %37 = vector.shape_cast %36 : vector<8xf32> to vector<8x1xf32>
    %38 = arith.mulf %35, %35 : vector<8x128xf32>
    %cst_19 = arith.constant dense<0.000000e+00> : vector<8xf32>
    %39 = vector.multi_reduction <add>, %38, %cst_19 [1] : vector<8x128xf32> to vector<8xf32>
    %40 = vector.shape_cast %39 : vector<8xf32> to vector<8x1xf32>
    %cst_20 = arith.constant 3.125000e-02 : f32
    %41 = vector.broadcast %cst_20 : f32 to vector<8x1xf32>
    %42 = arith.mulf %37, %41 : vector<8x1xf32>
    %cst_21 = arith.constant 3.125000e-02 : f32
    %43 = vector.broadcast %cst_21 : f32 to vector<8x1xf32>
    %44 = arith.mulf %40, %43 : vector<8x1xf32>
    %45 = arith.mulf %42, %42 : vector<8x1xf32>
    %46 = arith.subf %44, %45 : vector<8x1xf32>
    %cst_22 = arith.constant 0.000000e+00 : f32
    %47 = vector.broadcast %cst_22 : f32 to vector<8x1xf32>
    %48 = arith.maximumf %46, %47 : vector<8x1xf32>
    %49 = vector.broadcast %42 : vector<8x1xf32> to vector<8x128xf32>
    %50 = arith.subf %35, %49 : vector<8x128xf32>
    %cst_23 = arith.constant 9.99999997E-7 : f32
    %51 = vector.broadcast %cst_23 : f32 to vector<8x1xf32>
    %52 = arith.addf %48, %51 : vector<8x1xf32>
    %53 = math.rsqrt %52 : vector<8x1xf32>
    %54 = vector.broadcast %53 : vector<8x1xf32> to vector<8x128xf32>
    %55 = arith.mulf %50, %54 : vector<8x128xf32>
    %c0_24 = arith.constant 0 : index
    %c0_25 = arith.constant 0 : index
    %56 = vector.load %arg6[%c0_24, %c0_25] : memref<1x128xf32, #tpu.memory_space<vmem>>, vector<1x128xf32>
    %57 = vector.broadcast %56 : vector<1x128xf32> to vector<8x128xf32>
    %58 = arith.mulf %55, %57 : vector<8x128xf32>
    %c0_26 = arith.constant 0 : index
    %c0_27 = arith.constant 0 : index
    %59 = vector.load %arg7[%c0_26, %c0_27] : memref<1x128xf32, #tpu.memory_space<vmem>>, vector<1x128xf32>
    %60 = vector.broadcast %59 : vector<1x128xf32> to vector<8x128xf32>
    %61 = arith.addf %58, %60 : vector<8x128xf32>
    %c0_28 = arith.constant 0 : index
    %c0_29 = arith.constant 0 : index
    %62 = vector.load %arg8[%c0_28, %c0_29] : memref<8x128xf32, #tpu.memory_space<vmem>>, vector<8x128xf32>
    tpu.vector_store %arg8[%c0_28, %c0_29], %61 {strides = array<i32>} : memref<8x128xf32, #tpu.memory_space<vmem>>, vector<8x128xf32>,
    return
  }
  func.func @transform_0(%arg0: i32) -> (i32, i32) {
    %c0_i32 = arith.constant 0 : i32
    %c0_i32_0 = arith.constant 0 : i32
    return %arg0, %c0_i32 : i32, i32
  }
  func.func @transform_1(%arg0: i32) -> (i32, i32) {
    %c0_i32 = arith.constant 0 : i32
    %c0_i32_0 = arith.constant 0 : i32
    %c0_i32_1 = arith.constant 0 : i32
    return %c0_i32, %c0_i32_0 : i32, i32
  }
  func.func @transform_2(%arg0: i32) -> (i32, i32) {
    %c0_i32 = arith.constant 0 : i32
    %c0_i32_0 = arith.constant 0 : i32
    %c0_i32_1 = arith.constant 0 : i32
    return %c0_i32, %c0_i32_0 : i32, i32
  }
  func.func @transform_3(%arg0: i32) -> (i32, i32) {
    %c0_i32 = arith.constant 0 : i32
    %c0_i32_0 = arith.constant 0 : i32
    %c0_i32_1 = arith.constant 0 : i32
    return %c0_i32, %c0_i32_0 : i32, i32
  }
  func.func @transform_4(%arg0: i32) -> (i32, i32) {
    %c0_i32 = arith.constant 0 : i32
    %c0_i32_0 = arith.constant 0 : i32
    %c0_i32_1 = arith.constant 0 : i32
    return %c0_i32, %c0_i32_0 : i32, i32
  }
  func.func @transform_5(%arg0: i32) -> (i32, i32) {
    %c0_i32 = arith.constant 0 : i32
    %c0_i32_0 = arith.constant 0 : i32
    %c0_i32_1 = arith.constant 0 : i32
    return %c0_i32, %c0_i32_0 : i32, i32
  }
  func.func @transform_6(%arg0: i32) -> (i32, i32) {
    %c0_i32 = arith.constant 0 : i32
    %c0_i32_0 = arith.constant 0 : i32
    %c0_i32_1 = arith.constant 0 : i32
    return %c0_i32, %c0_i32_0 : i32, i32
  }
  func.func @transform_7(%arg0: i32) -> (i32, i32) {
    %c0_i32 = arith.constant 0 : i32
    %c0_i32_0 = arith.constant 0 : i32
    return %arg0, %c0_i32 : i32, i32
  }
}

</mosaic_0001>

<bundles_post_ra>
// kernel: projection_dis_mirna.1
= control target key start
LH: loop header
LB: loop body
LE: loop exit
PB: predicated region body
PF: predicated region fallthrough
CT: control target
= control target key end

     0   :  { %v438_v1 = vmov 0.0   ;;  %vm439_vm0 = vmmov 0   ;;  %s556_s0 = inlined_call_operand.vmem [shape: bf16[8,128], index: 0, kind: input, shape index: {}]   ;;  %s557_s1 = inlined_call_operand.vmem [shape: bf16[128,128], index: 1, kind: input, shape index: {}]   ;;  %s558_s2 = inlined_call_operand.vmem [shape: f32[1,128], index: 2, kind: input, shape index: {}]   ;;  %s559_s3 = inlined_call_operand.vmem [shape: bf16[128,128], index: 3, kind: input, shape index: {}]   ;;  %s560_s4 = inlined_call_operand.vmem [shape: f32[1,128], index: 4, kind: input, shape index: {}]   ;;  %s561_s5 = inlined_call_operand.vmem [shape: f32[1,128], index: 5, kind: input, shape index: {}]   ;;  %s562_s6 = inlined_call_operand.vmem [shape: f32[1,128], index: 6, kind: input, shape index: {}]   ;;  %s563_s7 = inlined_call_operand.hbm [shape: f32[8,128], index: 7, kind: output, shape index: {}]  }
   0x1   :  { %v394_v0 = vld [vmem:[%s557_s1] sm:$0xff]   ;;  %351 = vmatprep.subr.bf16.mxu0 %v438_v1  ;;  %371 = vmatprep.subr.bf16.mxu1 %v438_v1  ;;  %v395_v2 = vld [vmem:[%s557_s1 + $0x8] sm:$0xff]   ;;  %v396_v3 = vld [vmem:[%s557_s1 + $0x10] sm:$0xff]  }
   0x2   :  { %352 = vmatpush3.bf16.msra.mxu0 %v394_v0  ;;  %367 = vmatprep.mubr.msk.bf16.mxu0 %vm439_vm0, %v438_v1  ;;  %v397_v4 = vld [vmem:[%s557_s1 + $0x18] sm:$0xff]   ;;  %v398_v5 = vld [vmem:[%s557_s1 + $0x20] sm:$0xff]  }
   0x3   :  { %353 = vmatprep.subr.bf16.mxu0 %v438_v1  ;;  %387 = vmatprep.mubr.msk.bf16.mxu1 %vm439_vm0, %v438_v1 }
   0x6   :  { %354 = vmatpush3.bf16.msra.mxu0 %v395_v2 }
   0x7   :  { %355 = vmatprep.subr.bf16.mxu0 %v438_v1 }
   0xa   :  { %356 = vmatpush3.bf16.msra.mxu0 %v396_v3 }
   0xb   :  { %357 = vmatprep.subr.bf16.mxu0 %v438_v1 }
   0xe   :  { %358 = vmatpush3.bf16.msra.mxu0 %v397_v4 }
   0xf   :  { %12 = vsyncpa [#allocation3], 0  ;;  %359 = vmatprep.subr.bf16.mxu0 %v438_v1  ;;  %v399_v6 = vld [vmem:[%s557_s1 + $0x28] sm:$0xff]   ;;  %v400_v7 = vld [vmem:[%s557_s1 + $0x30] sm:$0xff]   ;;  %s440_s15 = smov [#allocation2]  }
  0x10   :  { %v401_v8 = vld [vmem:[%s557_s1 + $0x38] sm:$0xff]   ;;  %v28_v9 = vld [vmem:[%s556_s0] sm:$0xf]  ;;  %v403_v19 = vld [vmem:[%s559_s3 + $0x8] sm:$0xff]   ;;  %s305_s16 = sshll.u32 %s440_s15, 4  ;;  %s306_s16 = int_to_ptr.vmem [resolvable:$true] %s305_s16 }
  0x11   :  { %v402_v10 = vld [vmem:[%s559_s3] sm:$0xff]   ;;  %v404_v20 = vld [vmem:[%s559_s3 + $0x10] sm:$0xff]   ;;  %v405_v21 = vld [vmem:[%s559_s3 + $0x18] sm:$0xff]   ;;  %s414_s17 = scalar_lea.vmem %s306_s16, 128  ;;  %p419_p1 = scmp.lt.s32.totalorder %s306_s16, %s306_s16 }
  0x12   :  { %360 = vmatpush3.bf16.msra.mxu0 %v398_v5  ;;  %372 = vmatpush3.bf16.msra.mxu1 %v402_v10  ;;  %v313_v11 = vld [vmem:[%s558_s2] ss:$0 sm:$0xff]  ;;  %v407_v23 = vld [vmem:[%s559_s3 + $0x28] sm:$0xff]   ;;  %v408_v24 = vld [vmem:[%s559_s3 + $0x30] sm:$0xff]   ;;  %p415_p0 = scmp.ne.s32.totalorder %s306_s16, %s414_s17  ;;  %p420_p2 = scmp.lt.s32.totalorder %s414_s17, %s414_s17 }
  0x13   :  { %361 = vmatprep.subr.bf16.mxu0 %v438_v1  ;;  %373 = vmatprep.subr.bf16.mxu1 %v438_v1  ;;  %v406_v22 = vld [vmem:[%s559_s3 + $0x20] sm:$0xff]   ;;  %v409_v25 = vld [vmem:[%s559_s3 + $0x38] sm:$0xff]  }
  0x14   :  { %v322_v38 = vld [vmem:[%s560_s4] ss:$0 sm:$0xff]  ;;  %p421_p3 = por %p420_p2, %p419_p1 }
  0x15   :  { %v331_v56 = vld [vmem:[%s561_s5] ss:$0 sm:$0xff] }
  0x16   :  { %362 = vmatpush3.bf16.msra.mxu0 %v399_v6  ;;  %374 = vmatpush3.bf16.msra.mxu1 %v403_v19  ;;  %v332_v58 = vld [vmem:[%s562_s6] ss:$0 sm:$0xff]  ;;  %p422_p4 = pnand %p421_p3, %p415_p0 }
  0x17   :  { %363 = vmatprep.subr.bf16.mxu0 %v438_v1  ;;  %375 = vmatprep.subr.bf16.mxu1 %v438_v1 }
  0x1a   :  { %364 = vmatpush3.bf16.msra.mxu0 %v400_v7  ;;  %376 = vmatpush3.bf16.msra.mxu1 %v404_v20 }
  0x1b   :  { %365 = vmatprep.subr.bf16.mxu0 %v438_v1  ;;  %377 = vmatprep.subr.bf16.mxu1 %v438_v1 }
  0x1e   :  { %366 = vmatpush3.bf16.msra.mxu0 %v401_v8  ;;  %378 = vmatpush3.bf16.msra.mxu1 %v405_v21 }
  0x1f   :  { %379 = vmatprep.subr.bf16.mxu1 %v438_v1 }
  0x21   :  { %368 = vmatmul.mubr.bf16.vlgmr.msra.gmra.mrb[0].mxu0 %v28_v9 }
  0x22   :  { %380 = vmatpush3.bf16.msra.mxu1 %v406_v22 }
  0x23   :  { %381 = vmatprep.subr.bf16.mxu1 %v438_v1 }
  0x26   :  { %382 = vmatpush3.bf16.msra.mxu1 %v407_v23 }
  0x27   :  { %383 = vmatprep.subr.bf16.mxu1 %v438_v1 }
  0x2a   :  { %384 = vmatpush3.bf16.msra.mxu1 %v408_v24 }
  0x2b   :  { %385 = vmatprep.subr.bf16.mxu1 %v438_v1 }
  0x2e   :  { %386 = vmatpush3.bf16.msra.mxu1 %v409_v25 }
  0xf4   :  { %v134_v12 = vpop.f32.mrb[0].mxu0 }
  0xf5   :  { %v135_v13 = vadd.f32 %v313_v11, %v134_v12  ;;  %v369_v14 = vpop.f32.mrb[1].mxu0 }
  0xf6   :  { %v137_v15 = vpop.f32.mrb[2].mxu0 }
  0xf7   :  { %v140_v16 = vmax.f32 %v135_v13, 0.0  ;;  %v370_v17 = vpop.f32.mrb[3].mxu0 }
  0xf9   :  { %141 = vadd.xlane.f32.xlu0 %v140_v16  ;;  %v143_v18 = vmul.f32 %v140_v16, %v140_v16 }
  0xfd   :  { %144 = vadd.xlane.f32.xlu0 %v143_v18 }
 0x186   :  { %v142_v26 = vpop.xlane.xlu0 %141 }
 0x187   :  { %v146_v27 = vmul.f32 0.015625, %v142_v26 }
 0x189   :  { %v148_v29 = vmul.f32 %v146_v27, %v146_v27  ;;  %v151_v34 = vsub.f32 %v140_v16, %v146_v27 }
 0x18a   :  { %v145_v28 = vpop.xlane.xlu0 %144 }
 0x18b   :  { %v147_v30 = vmul.f32 0.015625, %v145_v28 }
 0x18d   :  { %v149_v31 = vsub.f32 %v147_v30, %v148_v29 }
 0x18f   :  { %v150_v32 = vmax.f32 %v149_v31, 0.0 }
 0x191   :  { %v152_v33 = vadd.f32 1e-06, %v150_v32 }
 0x193   :  { %410 = vrsqrt.f32 %v152_v33 }
 0x19d   :  { %v411_v35 = vpop.eup %410 }
 0x19e   :  { %v154_v36 = vmul.f32 %v411_v35, %v151_v34 }
 0x1a0   :  { %v155_v37 = vpack.c.bf16 %v154_v36, %v154_v36 }
 0x1a2   :  { %388 = vmatmul.mubr.bf16.vlgmr.msra.gmra.mrb[0].mxu1 %v155_v37 }
 0x275   :  { %v261_v39 = vpop.f32.mrb[0].mxu1 }
 0x276   :  { %v262_v40 = vadd.f32 %v322_v38, %v261_v39  ;;  %v389_v41 = vpop.f32.mrb[1].mxu1 }
 0x277   :  { %v264_v42 = vpop.f32.mrb[2].mxu1 }
 0x278   :  { %v267_v43 = vmax.f32 %v262_v40, 0.0  ;;  %v390_v44 = vpop.f32.mrb[3].mxu1 }
 0x27a   :  { %268 = vadd.xlane.f32.xlu1 %v267_v43  ;;  %v270_v45 = vmul.f32 %v267_v43, %v267_v43 }
 0x27e   :  { %271 = vadd.xlane.f32.xlu1 %v270_v45 }
 0x307   :  { %v269_v46 = vpop.xlane.xlu1 %268 }
 0x308   :  { %v273_v47 = vmul.f32 0.03125, %v269_v46 }
 0x30a   :  { %v275_v49 = vmul.f32 %v273_v47, %v273_v47  ;;  %v278_v54 = vsub.f32 %v267_v43, %v273_v47 }
 0x30b   :  { %v272_v48 = vpop.xlane.xlu1 %271 }
 0x30c   :  { %v274_v50 = vmul.f32 0.03125, %v272_v48 }
 0x30e   :  { %v276_v51 = vsub.f32 %v274_v50, %v275_v49 }
 0x310   :  { %v277_v52 = vmax.f32 %v276_v51, 0.0 }
 0x312   :  { %v279_v53 = vadd.f32 1e-06, %v277_v52 }
 0x314   :  { %412 = vrsqrt.f32 %v279_v53 }
 0x31e   :  { %v413_v55 = vpop.eup %412 }
 0x31f   :  { %v281_v57 = vmul.f32 %v413_v55, %v278_v54 }
 0x321   :  { %v289_v59 = vmul.f32 %v331_v56, %v281_v57 }
 0x323   :  { %v297_v60 = vadd.f32 %v332_v58, %v289_v59 }
 0x325   :  { %298 = vst [vmem:[#allocation2] sm:$0xff] %v297_v60 }
 0x326   :  { %425 = shalt.err (!%p422_p4)
}
 0x327   :  { %s426_s19 = scalar_lea.hbm %s563_s7, 128 }
 0x328   :  { %p427_p5 = scmp.ne.s32.totalorder %s563_s7, %s426_s19  ;;  %p430_p6 = scmp.lt.u32.totalorder %s426_s19, %s563_s7 }
 0x32a   :  { %p432_p7 = pnand %p430_p6, %p427_p5 }
 0x32c   :  { %435 = shalt.err (!%p432_p7)
}
 0x32d   :  { %308 = dma.vmem_to_hbm [thread:$0]  %s306_s16, 128, %s563_s7, [#allocation3]  }
 0x32e   :  { %436 = dma.done.wait [#allocation3], 128  }
 0x32f   :  { %437 = vsyncadd [#allocation3], 4294967168 }
 0x330   :  { %312 = vsyncpa [#allocation3], 1 }

</bundles_post_ra>
